<compile_context>
chip_gen: v7x
topology: tpu7x:2x2x1
jax: 0.10.0
libtpu: 0.0.40
codegen_flags: <defaults>
</compile_context>

<pallas_src>
import functools

import jax
import jax.numpy as jnp
from jax import lax
from jax.experimental import pallas as pl
from jax.experimental.pallas import tpu as pltpu


def _round_up(x, m):
    return ((x + m - 1) // m) * m


def _ssim_sums_kernel(x_ref, y_ref, o_ref, acc_ref, *, tile_rows, w, n_rows,
                      tiles_per_core, need_mask):
    # x_ref / y_ref: (tile_rows, w) input blocks (native dtype, upcast here).
    # o_ref: (1, 4, w) per-core partial sums [S_x, S_y, S_xx, S_xy].
    # acc_ref: (4, w) f32 VMEM accumulator, persistent across the t-loop.
    t = pl.program_id(1)

    @pl.when(t == 0)
    def _init():
        acc_ref[...] = jnp.zeros_like(acc_ref)

    xt = x_ref[...].astype(jnp.float32)
    yt = y_ref[...].astype(jnp.float32)

    if need_mask:
        # Zero out rows beyond the logical array (ragged last block and any
        # redundant grid steps introduced by the per-core split).
        s = pl.program_id(0)
        row0 = (s * tiles_per_core + t) * tile_rows
        rid = row0 + lax.broadcasted_iota(jnp.int32, (tile_rows, w), 0)
        valid = rid < n_rows
        xt = jnp.where(valid, xt, 0.0)
        yt = jnp.where(valid, yt, 0.0)

    # Reduce over the sublane (row) axis only; the cheap per-column partials
    # accumulate in VMEM, and the cross-lane reduce happens once in JAX.
    acc_ref[0] += jnp.sum(xt, axis=0)
    acc_ref[1] += jnp.sum(yt, axis=0)
    acc_ref[2] += jnp.sum(xt * xt, axis=0)
    acc_ref[3] += jnp.sum(xt * yt, axis=0)

    @pl.when(t == pl.num_programs(1) - 1)
    def _write():
        o_ref[0] = acc_ref[...]


def ssim_loss(x, y, *, SSIM_c1=0.2, SSIM_c2=0.2, SSIM_c3=0.1,
              arfa=1, beta=1, gamma=1,
              max_block_bytes=2 * 1024 * 1024, num_splits=2):
    """Pallas equivalent of Loss.forward(input, target) for NCHW tensors."""
    assert x.shape == y.shape, f"expected input size {y.shape} but got {x.shape}"
    N, C, H, W = x.shape
    total = N * C * H * W
    n_input = float(C * H * W)
    n_target = float(C * H * W)
    n_elems = float(total)

    dtype_bytes = jnp.dtype(x.dtype).itemsize
    # Sublane packing: f32 -> 8, bf16 -> 16, 8-bit -> 32 rows per packed tile.
    pack = {4: 8, 2: 16, 1: 32}.get(dtype_bytes, 8)

    # Free (layout-preserving) 2D view of the flattened tensor; no jnp.pad copy.
    if total % 128 == 0:
        w_eff = 128
        n_rows = total // 128
    else:
        w_eff = W
        n_rows = N * C * H
    x2 = x.reshape(n_rows, w_eff)
    y2 = y.reshape(n_rows, w_eff)

    # ~max_block_bytes per input per grid step, dtype-aware row alignment.
    rows_budget = max(pack,
                      (max_block_bytes // max(w_eff * dtype_bytes, 1)) // pack * pack)
    tile_rows = min(rows_budget, _round_up(n_rows, pack))
    tiles_total = pl.cdiv(n_rows, tile_rows)
    split = max(1, min(num_splits, tiles_total))        # 2-way for v7x megacore
    tiles_per_core = pl.cdiv(tiles_total, split)
    need_mask = split * tiles_per_core * tile_rows != n_rows

    kernel = functools.partial(
        _ssim_sums_kernel, tile_rows=tile_rows, w=w_eff, n_rows=n_rows,
        tiles_per_core=tiles_per_core, need_mask=need_mask)

    def in_map(s, t):
        # Clamp so redundant grid steps (ragged split) re-read a valid block;
        # their contribution is zeroed by the row mask.
        return (jnp.minimum(s * tiles_per_core + t, tiles_total - 1), 0)

    partials = pl.pallas_call(
        kernel,
        out_shape=jax.ShapeDtypeStruct((split, 4, w_eff), jnp.float32),
        grid=(split, tiles_per_core),
        in_specs=[
            pl.BlockSpec((tile_rows, w_eff), in_map),
            pl.BlockSpec((tile_rows, w_eff), in_map),
        ],
        out_specs=pl.BlockSpec((1, 4, w_eff), lambda s, t: (s, 0, 0)),
        scratch_shapes=[pltpu.VMEM((4, w_eff), jnp.float32)],
        compiler_params=pltpu.CompilerParams(
            dimension_semantics=("parallel", "arbitrary"),
            vmem_limit_bytes=32 * 1024 * 1024),
        cost_estimate=pl.CostEstimate(
            flops=6 * total,
            transcendentals=0,
            bytes_accessed=2 * total * dtype_bytes + split * 4 * w_eff * 4),
    )(x2, y2)

    # Combine per-core / per-column partials and run the tiny scalar epilogue.
    sums = jnp.sum(partials, axis=(0, 2))
    s_x, s_y, s_xx, s_xy = sums[0], sums[1], sums[2], sums[3]

    mu_x = s_x / n_input
    mu_y = s_y / n_target
    # sum((mu - x)^2) = S_xx - 2*mu*S_x + n_elems*mu^2
    # NOTE: the PyTorch reference uses `input` (x) inside sigma_y too; kept.
    var_x = (s_xx - 2.0 * mu_x * s_x + n_elems * mu_x * mu_x) / n_input
    var_y = (s_xx - 2.0 * mu_y * s_x + n_elems * mu_y * mu_y) / n_target
    sigma_x = jnp.sqrt(jnp.maximum(var_x, 0.0))
    sigma_y = jnp.sqrt(jnp.maximum(var_y, 0.0))
    sigma2_xy = s_xy / n_input - mu_x * mu_y

    ssim_l = (2.0 * mu_x * mu_x + SSIM_c1) / (mu_x * mu_x + mu_y * mu_y + SSIM_c1)
    ssim_c = (2.0 * sigma2_xy + SSIM_c2) / (sigma_x * sigma_x +
                                            sigma_y * sigma_y + SSIM_c2)
    ssim_s = (sigma2_xy + SSIM_c3) / (sigma_x * sigma_y + SSIM_c3)
    ssim = (ssim_l ** arfa) * (ssim_c ** beta) * (ssim_s ** gamma)
    return 1.0 - ssim


def _reference(x, y, SSIM_c1=0.2, SSIM_c2=0.2, SSIM_c3=0.1,
               arfa=1, beta=1, gamma=1):
    # Pure-JAX mirror of the PyTorch module (silent correctness check).
    x = x.astype(jnp.float32)
    y = y.astype(jnp.float32)
    n_in = float(x.shape[1] * x.shape[2] * x.shape[3])
    n_tg = float(y.shape[1] * y.shape[2] * y.shape[3])
    mu_x = jnp.sum(x) / n_in
    mu_y = jnp.sum(y) / n_tg
    sigma_x = jnp.sqrt(jnp.sum((mu_x - x) ** 2) / n_in)
    sigma_y = jnp.sqrt(jnp.sum((mu_y - x) ** 2) / n_tg)  # same "input" use as torch
    sigma2_xy = jnp.sum(x * y) / n_in - mu_x * mu_y
    L = (2.0 * mu_x * mu_x + SSIM_c1) / (mu_x * mu_x + mu_y * mu_y + SSIM_c1)
    C = (2.0 * sigma2_xy + SSIM_c2) / (sigma_x * sigma_x + sigma_y * sigma_y + SSIM_c2)
    S = (sigma2_xy + SSIM_c3) / (sigma_x * sigma_y + SSIM_c3)
    return 1.0 - (L ** arfa) * (C ** beta) * (S ** gamma)


if __name__ == "__main__":
    key = jax.random.PRNGKey(0)
    k1, k2, k3, k4 = jax.random.split(key, 4)

    # Primary check: NCHW image-loss shape (lane-dense fast path).
    x = jax.random.normal(k1, (2, 4, 16, 16), dtype=jnp.float32) * 0.5 + 0.5
    y = jax.random.normal(k2, (2, 4, 16, 16), dtype=jnp.float32) * 0.5 + 0.5
    ref = _reference(x, y)
    loss = jax.block_until_ready(ssim_loss(x, y))
    assert jnp.isfinite(loss), "non-finite loss"
    assert jnp.allclose(loss, ref, rtol=1e-4, atol=1e-5), (loss, ref)

    # Multi-tile accumulation along the "arbitrary" reduction axis.
    loss_t = jax.block_until_ready(ssim_loss(x, y, max_block_bytes=4096, num_splits=1))
    assert jnp.allclose(loss_t, ref, rtol=1e-4, atol=1e-5), (loss_t, ref)

    # Two-way "parallel" split (maps onto both TensorCores on v7x).
    loss_p = jax.block_until_ready(ssim_loss(x, y, max_block_bytes=4096, num_splits=2))
    assert jnp.allclose(loss_p, ref, rtol=1e-4, atol=1e-5), (loss_p, ref)

    # Non-multiple-of-128 total: no-pad path + in-kernel tail masking.
    xo = jax.random.normal(k3, (1, 3, 17, 19), dtype=jnp.float32) * 0.5 + 0.5
    yo = jax.random.normal(k4, (1, 3, 17, 19), dtype=jnp.float32) * 0.5 + 0.5
    ref_o = _reference(xo, yo)
    loss_o = jax.block_until_ready(ssim_loss(xo, yo))
    assert jnp.isfinite(loss_o), "non-finite loss (odd shape)"
    assert jnp.allclose(loss_o, ref_o, rtol=1e-4, atol=1e-5), (loss_o, ref_o)

    # Masked + multi-tile + split (exercises clamped index_map on ragged grid).
    loss_om = jax.block_until_ready(ssim_loss(xo, yo, max_block_bytes=1024, num_splits=2))
    assert jnp.allclose(loss_om, ref_o, rtol=1e-4, atol=1e-5), (loss_om, ref_o)

    # bf16 inputs: dtype-aware sublane packing + in-kernel upcast.
    xb = x.astype(jnp.bfloat16)
    yb = y.astype(jnp.bfloat16)
    ref_b = _reference(xb, yb)
    loss_b = jax.block_until_ready(ssim_loss(xb, yb))
    assert jnp.allclose(loss_b, ref_b, rtol=5e-3, atol=1e-3), (loss_b, ref_b)

    print("KERNEL_OK")
</pallas_src>

<mosaic_0001>
module attributes {stable_mosaic.version = 11 : i64} {
  func.func @_ssim_sums_kernel(%arg0: i32, %arg1: i32, %arg2: memref<16x128xf32, #tpu.memory_space<vmem>>, %arg3: memref<16x128xf32, #tpu.memory_space<vmem>>, %arg4: memref<1x4x128xf32, #tpu.memory_space<vmem>>, %arg5: memref<4x128xf32, #tpu.memory_space<vmem>>) attributes {dimension_semantics = [#tpu.dimension_semantics<parallel>, #tpu.dimension_semantics<arbitrary>], iteration_bounds = array<i64: 1, 1>, scalar_prefetch = 0 : i64, scratch_operands = 1 : i64, tpu.core_type = #tpu.core_type<tc>, window_params = [{transform_indices = @transform_0, window_bounds = array<i64: 16, 128>}, {transform_indices = @transform_1, window_bounds = array<i64: 16, 128>}, {transform_indices = @transform_2, window_bounds = array<i64: 1, 4, 128>}]} {
    %c0_i32 = arith.constant 0 : i32
    %0 = arith.cmpi eq, %arg1, %c0_i32 : i32
    %1 = arith.extui %0 : i1 to i32
    %c0_i32_0 = arith.constant 0 : i32
    %2 = arith.cmpi ne, %1, %c0_i32_0 : i32
    scf.if %2 {
      %cst_22 = arith.constant 0.000000e+00 : f32
      %38 = vector.broadcast %cst_22 : f32 to vector<4x128xf32>
      %c0_23 = arith.constant 0 : index
      %c0_24 = arith.constant 0 : index
      %39 = vector.load %arg5[%c0_23, %c0_24] : memref<4x128xf32, #tpu.memory_space<vmem>>, vector<4x128xf32>
      tpu.vector_store %arg5[%c0_23, %c0_24], %38 {strides = array<i32>} : memref<4x128xf32, #tpu.memory_space<vmem>>, vector<4x128xf32>,
    } else {
    }
    %c0 = arith.constant 0 : index
    %c0_1 = arith.constant 0 : index
    %3 = vector.load %arg2[%c0, %c0_1] : memref<16x128xf32, #tpu.memory_space<vmem>>, vector<16x128xf32>
    %c0_2 = arith.constant 0 : index
    %c0_3 = arith.constant 0 : index
    %4 = vector.load %arg3[%c0_2, %c0_3] : memref<16x128xf32, #tpu.memory_space<vmem>>, vector<16x128xf32>
    %c0_4 = arith.constant 0 : index
    %c0_5 = arith.constant 0 : index
    %5 = vector.load %arg5[%c0_4, %c0_5] : memref<4x128xf32, #tpu.memory_space<vmem>>, vector<1x128xf32>
    %6 = vector.shape_cast %5 : vector<1x128xf32> to vector<128xf32>
    %cst = arith.constant dense<0.000000e+00> : vector<128xf32>
    %7 = vector.multi_reduction <add>, %3, %cst [0] : vector<16x128xf32> to vector<128xf32>
    %8 = arith.addf %6, %7 : vector<128xf32>
    %c0_6 = arith.constant 0 : index
    %c0_7 = arith.constant 0 : index
    %9 = vector.load %arg5[%c0_6, %c0_7] : memref<4x128xf32, #tpu.memory_space<vmem>>, vector<1x128xf32>
    %10 = vector.shape_cast %9 : vector<1x128xf32> to vector<128xf32>
    %11 = vector.shape_cast %8 : vector<128xf32> to vector<1x128xf32>
    tpu.vector_store %arg5[%c0_6, %c0_7], %11 {strides = array<i32>} : memref<4x128xf32, #tpu.memory_space<vmem>>, vector<1x128xf32>,
    %c1 = arith.constant 1 : index
    %c0_8 = arith.constant 0 : index
    %12 = vector.load %arg5[%c1, %c0_8] : memref<4x128xf32, #tpu.memory_space<vmem>>, vector<1x128xf32>
    %13 = vector.shape_cast %12 : vector<1x128xf32> to vector<128xf32>
    %cst_9 = arith.constant dense<0.000000e+00> : vector<128xf32>
    %14 = vector.multi_reduction <add>, %4, %cst_9 [0] : vector<16x128xf32> to vector<128xf32>
    %15 = arith.addf %13, %14 : vector<128xf32>
    %c1_10 = arith.constant 1 : index
    %c0_11 = arith.constant 0 : index
    %16 = vector.load %arg5[%c1_10, %c0_11] : memref<4x128xf32, #tpu.memory_space<vmem>>, vector<1x128xf32>
    %17 = vector.shape_cast %16 : vector<1x128xf32> to vector<128xf32>
    %18 = vector.shape_cast %15 : vector<128xf32> to vector<1x128xf32>
    tpu.vector_store %arg5[%c1_10, %c0_11], %18 {strides = array<i32>} : memref<4x128xf32, #tpu.memory_space<vmem>>, vector<1x128xf32>,
    %c2 = arith.constant 2 : index
    %c0_12 = arith.constant 0 : index
    %19 = vector.load %arg5[%c2, %c0_12] : memref<4x128xf32, #tpu.memory_space<vmem>>, vector<1x128xf32>
    %20 = vector.shape_cast %19 : vector<1x128xf32> to vector<128xf32>
    %21 = arith.mulf %3, %3 : vector<16x128xf32>
    %cst_13 = arith.constant dense<0.000000e+00> : vector<128xf32>
    %22 = vector.multi_reduction <add>, %21, %cst_13 [0] : vector<16x128xf32> to vector<128xf32>
    %23 = arith.addf %20, %22 : vector<128xf32>
    %c2_14 = arith.constant 2 : index
    %c0_15 = arith.constant 0 : index
    %24 = vector.load %arg5[%c2_14, %c0_15] : memref<4x128xf32, #tpu.memory_space<vmem>>, vector<1x128xf32>
    %25 = vector.shape_cast %24 : vector<1x128xf32> to vector<128xf32>
    %26 = vector.shape_cast %23 : vector<128xf32> to vector<1x128xf32>
    tpu.vector_store %arg5[%c2_14, %c0_15], %26 {strides = array<i32>} : memref<4x128xf32, #tpu.memory_space<vmem>>, vector<1x128xf32>,
    %c3 = arith.constant 3 : index
    %c0_16 = arith.constant 0 : index
    %27 = vector.load %arg5[%c3, %c0_16] : memref<4x128xf32, #tpu.memory_space<vmem>>, vector<1x128xf32>
    %28 = vector.shape_cast %27 : vector<1x128xf32> to vector<128xf32>
    %29 = arith.mulf %3, %4 : vector<16x128xf32>
    %cst_17 = arith.constant dense<0.000000e+00> : vector<128xf32>
    %30 = vector.multi_reduction <add>, %29, %cst_17 [0] : vector<16x128xf32> to vector<128xf32>
    %31 = arith.addf %28, %30 : vector<128xf32>
    %c3_18 = arith.constant 3 : index
    %c0_19 = arith.constant 0 : index
    %32 = vector.load %arg5[%c3_18, %c0_19] : memref<4x128xf32, #tpu.memory_space<vmem>>, vector<1x128xf32>
    %33 = vector.shape_cast %32 : vector<1x128xf32> to vector<128xf32>
    %34 = vector.shape_cast %31 : vector<128xf32> to vector<1x128xf32>
    tpu.vector_store %arg5[%c3_18, %c0_19], %34 {strides = array<i32>} : memref<4x128xf32, #tpu.memory_space<vmem>>, vector<1x128xf32>,
    %c0_i32_20 = arith.constant 0 : i32
    %35 = arith.cmpi eq, %arg1, %c0_i32_20 : i32
    %36 = arith.extui %35 : i1 to i32
    %c0_i32_21 = arith.constant 0 : i32
    %37 = arith.cmpi ne, %36, %c0_i32_21 : i32
    scf.if %37 {
      %c0_22 = arith.constant 0 : index
      %c0_23 = arith.constant 0 : index
      %38 = vector.load %arg5[%c0_22, %c0_23] : memref<4x128xf32, #tpu.memory_space<vmem>>, vector<4x128xf32>
      %c0_24 = arith.constant 0 : index
      %c0_25 = arith.constant 0 : index
      %c0_26 = arith.constant 0 : index
      %39 = vector.load %arg4[%c0_24, %c0_25, %c0_26] : memref<1x4x128xf32, #tpu.memory_space<vmem>>, vector<1x4x128xf32>
      %40 = vector.shape_cast %39 : vector<1x4x128xf32> to vector<4x128xf32>
      %41 = vector.shape_cast %38 : vector<4x128xf32> to vector<1x4x128xf32>
      tpu.vector_store %arg4[%c0_24, %c0_25, %c0_26], %41 {strides = array<i32>} : memref<1x4x128xf32, #tpu.memory_space<vmem>>, vector<1x4x128xf32>,
    } else {
    }
    return
  }
  func.func @transform_0(%arg0: i32, %arg1: i32) -> (i32, i32) {
    %c1_i32 = arith.constant 1 : i32
    %0 = arith.muli %arg0, %c1_i32 : i32
    %1 = arith.addi %0, %arg1 : i32
    %c0_i32 = arith.constant 0 : i32
    %2 = arith.minsi %1, %c0_i32 : i32
    %c0_i32_0 = arith.constant 0 : i32
    %c0_i32_1 = arith.constant 0 : i32
    return %2, %c0_i32_0 : i32, i32
  }
  func.func @transform_1(%arg0: i32, %arg1: i32) -> (i32, i32) {
    %c1_i32 = arith.constant 1 : i32
    %0 = arith.muli %arg0, %c1_i32 : i32
    %1 = arith.addi %0, %arg1 : i32
    %c0_i32 = arith.constant 0 : i32
    %2 = arith.minsi %1, %c0_i32 : i32
    %c0_i32_0 = arith.constant 0 : i32
    %c0_i32_1 = arith.constant 0 : i32
    return %2, %c0_i32_0 : i32, i32
  }
  func.func @transform_2(%arg0: i32, %arg1: i32) -> (i32, i32, i32) {
    %c0_i32 = arith.constant 0 : i32
    %c0_i32_0 = arith.constant 0 : i32
    %c0_i32_1 = arith.constant 0 : i32
    return %arg0, %c0_i32, %c0_i32_0 : i32, i32, i32
  }
}

</mosaic_0001>

<bundles_post_ra>
// kernel: tpu_custom_call.1
= control target key start
LH: loop header
LB: loop body
LE: loop exit
PB: predicated region body
PF: predicated region fallthrough
CT: control target
= control target key end

     0   :  { %7 = vsyncpa [#allocation4], 0  ;;  %s273_s0 = inlined_call_operand.hbm [shape: f32[16,128], index: 0, kind: input, shape index: {}]   ;;  %s274_s1 = inlined_call_operand.hbm [shape: f32[16,128], index: 1, kind: input, shape index: {}]   ;;  %s275_s2 = inlined_call_operand.hbm [shape: f32[1,4,128], index: 2, kind: output, shape index: {}]  }
   0x1   :  { %8 = vsyncpa [#allocation7], 0 }
   0x2   :  { %9 = vsyncpa [#allocation5], 0  ;;  %s216_s9 = smov [#allocation3]   ;;  %s144_s13 = scalar_lea.hbm %s273_s0, 256 }
   0x3   :  { %s21_s10 = sshll.u32 %s216_s9, 4  ;;  %p145_p0 = scmp.ne.s32.totalorder %s273_s0, %s144_s13  ;;  %s22_s10 = int_to_ptr.vmem [resolvable:$true] %s21_s10 }
   0x4   :  { %p148_p1 = scmp.lt.u32.totalorder %s144_s13, %s273_s0 }
   0x6   :  { %p150_p2 = pnand %p148_p1, %p145_p0 }
   0x8   :  { %153 = shalt.err (!%p150_p2)
}
   0x9   :  { %s154_s18 = scalar_lea.vmem %s22_s10, 256  ;;  %p159_p4 = scmp.lt.s32.totalorder %s22_s10, %s22_s10 }
   0xa   :  { %p155_p3 = scmp.ne.s32.totalorder %s22_s10, %s154_s18  ;;  %p160_p5 = scmp.lt.s32.totalorder %s154_s18, %s154_s18 }
   0xc   :  { %p161_p6 = por %p160_p5, %p159_p4 }
   0xe   :  { %p162_p7 = pnand %p161_p6, %p155_p3 }
  0x10   :  { %165 = shalt.err (!%p162_p7)
}
  0x11   :  { %s217_s19 = smov 128   ;;  %s218_s20 = smov 8  }
  0x12   :  { %27 = dma.hbm_to_vmem [thread:$0]  %s273_s0, 256, %s22_s10, [#allocation4], %s217_s19, %s217_s19, %s218_s20  }
  0x13   :  { %s219_s23 = smov [#allocation6]   ;;  %s166_s27 = scalar_lea.hbm %s274_s1, 256 }
  0x14   :  { %s39_s24 = sshll.u32 %s219_s23, 4  ;;  %p167_p8 = scmp.ne.s32.totalorder %s274_s1, %s166_s27  ;;  %s40_s24 = int_to_ptr.vmem [resolvable:$true] %s39_s24 }
  0x15   :  { %p170_p9 = scmp.lt.u32.totalorder %s166_s27, %s274_s1 }
  0x17   :  { %p172_p10 = pnand %p170_p9, %p167_p8 }
  0x19   :  { %175 = shalt.err (!%p172_p10)
}
  0x1a   :  { %s176_s4 = scalar_lea.vmem %s40_s24, 256  ;;  %p181_p12 = scmp.lt.s32.totalorder %s40_s24, %s40_s24 }
  0x1b   :  { %p177_p11 = scmp.ne.s32.totalorder %s40_s24, %s176_s4  ;;  %p182_p13 = scmp.lt.s32.totalorder %s176_s4, %s176_s4 }
  0x1d   :  { %p183_p0 = por %p182_p13, %p181_p12 }
  0x1f   :  { %p184_p1 = pnand %p183_p0, %p177_p11 }
  0x21   :  { %187 = shalt.err (!%p184_p1)
}
  0x22   :  { %45 = dma.hbm_to_vmem [thread:$0]  %s274_s1, 256, %s40_s24, [#allocation7], %s217_s19, %s217_s19, %s218_s20  }
  0x23   :  { %210 = dma.done.wait [#allocation4], 256  }
  0x24   :  { %211 = vsyncadd [#allocation4], 4294967040 }
  0x25   :  { %212 = dma.done.wait [#allocation7], 256  }
  0x26   :  { %213 = vsyncadd [#allocation7], 4294967040  ;;  %v220_v0 = vmov 0.0   ;;  %v65_v1 = vld [vmem:[#allocation3] sm:$0xff]  ;;  %v66_v2 = vld [vmem:[#allocation3 + $0x8] sm:$0xff]  ;;  %s221_s1 = smov [#allocation8]  }
  0x27   :  { %64 = vst [vmem:[#allocation2] sm:$0xf] %v220_v0  ;;  %v67_v3 = vld [vmem:[#allocation6] sm:$0xff]  ;;  %v70_v4 = vadd.f32 %v66_v2, %v65_v1  ;;  %v68_v5 = vld [vmem:[#allocation6 + $0x8] sm:$0xff]  ;;  %v90_v6 = vmul.f32 %v65_v1, %v65_v1  ;;  %v91_v7 = vmul.f32 %v66_v2, %v66_v2  ;;  %s124_s6 = sshll.u32 %s221_s1, 4  ;;  %s125_s6 = int_to_ptr.vmem [resolvable:$true] %s124_s6 }
  0x28   :  { %v102_v8 = vmul.f32 %v67_v3, %v65_v1  ;;  %v80_v9 = vadd.f32 %v68_v5, %v67_v3  ;;  %v103_v10 = vmul.f32 %v68_v5, %v66_v2  ;;  %s188_s7 = scalar_lea.vmem %s125_s6, 64  ;;  %p193_p3 = scmp.lt.s32.totalorder %s125_s6, %s125_s6 }
  0x29   :  { %v71_v11 = vrot.slane %v70_v4, 4  ;;  %v92_v12 = vadd.f32 %v91_v7, %v90_v6  ;;  %p189_p2 = scmp.ne.s32.totalorder %s125_s6, %s188_s7  ;;  %p194_p4 = scmp.lt.s32.totalorder %s188_s7, %s188_s7 }
  0x2a   :  { %v81_v13 = vrot.slane %v80_v9, 4  ;;  %v104_v14 = vadd.f32 %v103_v10, %v102_v8 }
  0x2b   :  { %v72_v15 = vadd.f32 %v71_v11, %v70_v4  ;;  %v93_v16 = vrot.slane %v92_v12, 4  ;;  %p195_p5 = por %p194_p4, %p193_p3 }
  0x2c   :  { %v82_v17 = vadd.f32 %v81_v13, %v80_v9  ;;  %v105_v18 = vrot.slane %v104_v14, 4 }
  0x2d   :  { %v73_v19 = vrot.slane %v72_v15, 2  ;;  %v94_v20 = vadd.f32 %v93_v16, %v92_v12  ;;  %p196_p6 = pnand %p195_p5, %p189_p2 }
  0x2e   :  { %v83_v21 = vrot.slane %v82_v17, 2  ;;  %v106_v22 = vadd.f32 %v105_v18, %v104_v14  ;;  %v69_v29 = vld [vmem:[#allocation2] sm:$0x1]  ;;  %v79_v33 = vld [vmem:[#allocation2 + $0x1] sm:$0x1] }
  0x2f   :  { %v74_v23 = vadd.f32 %v73_v19, %v72_v15  ;;  %v95_v24 = vrot.slane %v94_v20, 2  ;;  %v89_v36 = vld [vmem:[#allocation2 + $0x2] sm:$0x1]  ;;  %v101_v40 = vld [vmem:[#allocation2 + $0x3] sm:$0x1] }
  0x30   :  { %v84_v25 = vadd.f32 %v83_v21, %v82_v17  ;;  %v107_v26 = vrot.slane %v106_v22, 2 }
  0x31   :  { %v75_v27 = vrot.slane %v74_v23, 1  ;;  %v96_v28 = vadd.f32 %v95_v24, %v94_v20 }
  0x32   :  { %v85_v30 = vrot.slane %v84_v25, 1  ;;  %v108_v31 = vadd.f32 %v107_v26, %v106_v22 }
  0x33   :  { %v76_v32 = vadd.f32 %v75_v27, %v74_v23  ;;  %v97_v34 = vrot.slane %v96_v28, 1 }
  0x34   :  { %v86_v35 = vadd.f32 %v85_v30, %v84_v25  ;;  %v109_v37 = vrot.slane %v108_v31, 1 }
  0x35   :  { %v77_v38 = vadd.f32 %v76_v32, %v69_v29  ;;  %v98_v39 = vadd.f32 %v97_v34, %v96_v28 }
  0x36   :  { %v87_v41 = vadd.f32 %v86_v35, %v79_v33  ;;  %v110_v42 = vadd.f32 %v109_v37, %v108_v31 }
  0x37   :  { %78 = vst [vmem:[#allocation2] sm:$0x1] %v77_v38  ;;  %v99_v43 = vadd.f32 %v98_v39, %v89_v36 }
  0x38   :  { %88 = vst [vmem:[#allocation2 + $0x1] sm:$0x1] %v87_v41  ;;  %v111_v44 = vadd.f32 %v110_v42, %v101_v40 }
  0x39   :  { %100 = vst [vmem:[#allocation2 + $0x2] sm:$0x1] %v99_v43 }
  0x3a   :  { %112 = vst [vmem:[#allocation2 + $0x3] sm:$0x1] %v111_v44 }
  0x41   :  { %v116_v45 = vld [vmem:[#allocation2] sm:$0xf] }
  0x42   :  { %117 = vst [vmem:[#allocation8] sm:$0xf] %v116_v45 }
  0x43   :  { %199 = shalt.err (!%p196_p6)
}
  0x44   :  { %s200_s10 = scalar_lea.hbm %s275_s2, 64 }
  0x45   :  { %p201_p7 = scmp.ne.s32.totalorder %s275_s2, %s200_s10  ;;  %p204_p8 = scmp.lt.u32.totalorder %s200_s10, %s275_s2 }
  0x47   :  { %p206_p9 = pnand %p204_p8, %p201_p7 }
  0x49   :  { %209 = shalt.err (!%p206_p9)
}
  0x4a   :  { %127 = dma.vmem_to_hbm [thread:$0]  %s125_s6, 64, %s275_s2, [#allocation5]  }
  0x4b   :  { %214 = dma.done.wait [#allocation5], 64  }
  0x4c   :  { %215 = vsyncadd [#allocation5], 4294967232 }
  0x4d   :  { %131 = vsyncpa [#allocation4], 1 }
  0x4e   :  { %132 = vsyncpa [#allocation7], 1 }
  0x4f   :  { %133 = vsyncpa [#allocation5], 1 }

</bundles_post_ra>
